<compile_context>
chip_gen: v7x
topology: tpu7x:2x2x1
jax: 0.10.0
libtpu: 0.0.40
codegen_flags: <defaults>
</compile_context>

<pallas_src>
import jax
import jax.numpy as jnp
from jax import lax
from jax.experimental import pallas as pl
from jax.experimental.pallas import tpu as pltpu


def _pick_tile(batch_size: int) -> int:
    """Largest MXU-friendly tile that divides B (256 fills v6e/v7x MXU)."""
    for t in (256, 128, 64, 32, 16, 8):
        if batch_size % t == 0:
            return t
    return batch_size  # small / oddly sized batch -> single full-array tile


def _make_contrastive_kernel(temperature: float, contrastive_type: str,
                             batch_size: int):
    if contrastive_type not in ('Orig', 'HardNeg'):
        raise Exception('Please specify the contrastive loss, Orig vs. HardNeg.')
    inv_t = 1.0 / float(temperature)
    hard_neg = contrastive_type == 'HardNeg'

    def kernel(f1_ref, f2_ref, out_ref, sum_e_ref, sum_e2_ref, diag_ref):
        i = pl.program_id(0)              # row tile (parallel)
        j = pl.program_id(1)              # col tile (reduction axis)

        @pl.when(j == 0)
        def _init():
            sum_e_ref[...] = jnp.zeros_like(sum_e_ref)
            sum_e2_ref[...] = jnp.zeros_like(sum_e2_ref)
            diag_ref[...] = jnp.zeros_like(diag_ref)

        # (T, T) logits tile on the MXU; contraction over dim 1 of both
        # operands avoids materializing f2.T.  f32 accumulation.
        s = lax.dot_general(
            f1_ref[...], f2_ref[...],
            dimension_numbers=(((1,), (1,)), ((), ())),
            preferred_element_type=jnp.float32,
        ) * inv_t                                            # sim / T
        e = jnp.exp(s)

        sum_e_ref[...] += jnp.sum(e, axis=-1, keepdims=True)
        if hard_neg:
            sum_e2_ref[...] += jnp.sum(e * e, axis=-1, keepdims=True)

        # Positive-pair logits live only on the diagonal of the i == j tile.
        @pl.when(j == i)
        def _diag():
            row = lax.broadcasted_iota(jnp.int32, s.shape, 0)
            col = lax.broadcasted_iota(jnp.int32, s.shape, 1)
            diag_ref[...] = jnp.sum(
                jnp.where(row == col, s, 0.0), axis=-1, keepdims=True)

        @pl.when(j == pl.num_programs(1) - 1)
        def _finalize():
            d = diag_ref[...]                    # sim_ii / T
            pos = jnp.exp(d)
            if hard_neg:
                # negimp == neg for positive entries, so:
                #   Ng = sum(neg^2) / (sum(neg) / (B - 1))
                sum_neg2 = sum_e2_ref[...] - pos * pos
                mean_neg = (sum_e_ref[...] - pos) / float(batch_size - 1)
                ng = sum_neg2 / mean_neg
            else:
                ng = sum_e_ref[...] - pos
            # -log(pos / (Ng + pos)) = log(Ng + pos) - log(pos) = log(Ng+pos) - d
            out_ref[...] = jnp.log(ng + pos) - d

    return kernel


def contrastive_loss(features_1, features_2, *, temperature=0.07,
                     contrastive_type='HardNeg', tile=None):
    assert features_1.shape == features_2.shape, (features_1.shape,
                                                  features_2.shape)
    B, D = features_1.shape
    T = tile if tile is not None else _pick_tile(B)
    assert B % T == 0, (B, T)
    n_tiles = B // T

    kernel = _make_contrastive_kernel(temperature, contrastive_type, B)

    per_row = pl.pallas_call(
        kernel,
        out_shape=jax.ShapeDtypeStruct((B, 1), jnp.float32),
        grid_spec=pltpu.PrefetchScalarGridSpec(
            num_scalar_prefetch=0,
            grid=(n_tiles, n_tiles),
            in_specs=[
                pl.BlockSpec((T, D), lambda i, j: (i, 0)),   # f1 row tile
                pl.BlockSpec((T, D), lambda i, j: (j, 0)),   # f2 col tile
            ],
            out_specs=pl.BlockSpec((T, 1), lambda i, j: (i, 0)),
            scratch_shapes=[
                pltpu.VMEM((T, 1), jnp.float32),   # rowsum(e)
                pltpu.VMEM((T, 1), jnp.float32),   # rowsum(e^2)  (HardNeg)
                pltpu.VMEM((T, 1), jnp.float32),   # sim_ii / T
            ],
        ),
        compiler_params=pltpu.CompilerParams(
            dimension_semantics=("parallel", "arbitrary"),
            # Headroom under v7x's 64 MiB physical VMEM (defaults are 16/32 MiB).
            vmem_limit_bytes=48 * 1024 * 1024,
        ),
    )(features_1, features_2)

    return jnp.sum(per_row) / B


def contrastive_loss_ref(f1, f2, *, temperature=0.07, contrastive_type='HardNeg'):
    """Pure-JAX reference mirroring the PyTorch module (sanity check)."""
    B = f1.shape[0]
    pos = jnp.exp(jnp.sum(f1 * f2, axis=-1) / temperature)
    e = jnp.exp((f1 @ f2.T) / temperature)
    offdiag = ~jnp.eye(B, dtype=bool)
    neg_sum = jnp.sum(jnp.where(offdiag, e, 0.0), axis=-1)
    if contrastive_type == 'Orig':
        Ng = neg_sum
    else:
        # negimp = neg.log().exp() == neg, so Ng = sum(neg^2) / mean(neg).
        neg2_sum = jnp.sum(jnp.where(offdiag, e * e, 0.0), axis=-1)
        Ng = neg2_sum / (neg_sum / (B - 1))
    return jnp.sum(-jnp.log(pos / (Ng + pos))) / B


if __name__ == "__main__":
    key = jax.random.PRNGKey(0)
    k1, k2 = jax.random.split(key)
    B, D = 32, 64  # small shapes; tile=16 below exercises the 2x2 tiled grid
    # L2-normalized features, as is typical for contrastive losses.
    f1 = jax.random.normal(k1, (B, D), dtype=jnp.float32)
    f2 = jax.random.normal(k2, (B, D), dtype=jnp.float32)
    f1 = f1 / jnp.linalg.norm(f1, axis=-1, keepdims=True)
    f2 = f2 / jnp.linalg.norm(f2, axis=-1, keepdims=True)

    # HardNeg path, explicit small tile -> (2, 2) grid with accumulation,
    # diagonal-tile extraction and finalize-at-last-j.
    loss_hn = contrastive_loss(f1, f2, temperature=0.07,
                               contrastive_type='HardNeg', tile=16)
    loss_hn = jax.block_until_ready(loss_hn)
    ref_hn = contrastive_loss_ref(f1, f2, temperature=0.07,
                                  contrastive_type='HardNeg')
    assert jnp.allclose(loss_hn, ref_hn, rtol=1e-4, atol=1e-4), (loss_hn, ref_hn)

    # Orig path with the default tile picker (single 32x32 tile).
    loss_o = contrastive_loss(f1, f2, temperature=0.07, contrastive_type='Orig')
    loss_o = jax.block_until_ready(loss_o)
    ref_o = contrastive_loss_ref(f1, f2, temperature=0.07,
                                 contrastive_type='Orig')
    assert jnp.allclose(loss_o, ref_o, rtol=1e-4, atol=1e-4), (loss_o, ref_o)

    print("KERNEL_OK")
</pallas_src>

<mosaic_0001>
module attributes {stable_mosaic.version = 11 : i64} {
  func.func @kernel(%arg0: i32, %arg1: i32, %arg2: memref<16x64xf32, #tpu.memory_space<vmem>>, %arg3: memref<16x64xf32, #tpu.memory_space<vmem>>, %arg4: memref<16x1xf32, #tpu.memory_space<vmem>>, %arg5: memref<16x1xf32, #tpu.memory_space<vmem>>, %arg6: memref<16x1xf32, #tpu.memory_space<vmem>>, %arg7: memref<16x1xf32, #tpu.memory_space<vmem>>) attributes {dimension_semantics = [#tpu.dimension_semantics<parallel>, #tpu.dimension_semantics<arbitrary>], iteration_bounds = array<i64: 2, 2>, scalar_prefetch = 0 : i64, scratch_operands = 3 : i64, tpu.core_type = #tpu.core_type<tc>, window_params = [{transform_indices = @transform_0, window_bounds = array<i64: 16, 64>}, {transform_indices = @transform_1, window_bounds = array<i64: 16, 64>}, {transform_indices = @transform_2, window_bounds = array<i64: 16, 1>}]} {
    %c0_i32 = arith.constant 0 : i32
    %0 = arith.cmpi eq, %arg1, %c0_i32 : i32
    %1 = arith.extui %0 : i1 to i32
    %c0_i32_0 = arith.constant 0 : i32
    %2 = arith.cmpi ne, %1, %c0_i32_0 : i32
    scf.if %2 {
      %cst_17 = arith.constant 0.000000e+00 : f32
      %26 = vector.broadcast %cst_17 : f32 to vector<16x1xf32>
      %c0_18 = arith.constant 0 : index
      %c0_19 = arith.constant 0 : index
      %27 = vector.load %arg5[%c0_18, %c0_19] : memref<16x1xf32, #tpu.memory_space<vmem>>, vector<16x1xf32>
      tpu.vector_store %arg5[%c0_18, %c0_19], %26 {strides = array<i32>} : memref<16x1xf32, #tpu.memory_space<vmem>>, vector<16x1xf32>,
      %cst_20 = arith.constant 0.000000e+00 : f32
      %28 = vector.broadcast %cst_20 : f32 to vector<16x1xf32>
      %c0_21 = arith.constant 0 : index
      %c0_22 = arith.constant 0 : index
      %29 = vector.load %arg6[%c0_21, %c0_22] : memref<16x1xf32, #tpu.memory_space<vmem>>, vector<16x1xf32>
      tpu.vector_store %arg6[%c0_21, %c0_22], %28 {strides = array<i32>} : memref<16x1xf32, #tpu.memory_space<vmem>>, vector<16x1xf32>,
      %cst_23 = arith.constant 0.000000e+00 : f32
      %30 = vector.broadcast %cst_23 : f32 to vector<16x1xf32>
      %c0_24 = arith.constant 0 : index
      %c0_25 = arith.constant 0 : index
      %31 = vector.load %arg7[%c0_24, %c0_25] : memref<16x1xf32, #tpu.memory_space<vmem>>, vector<16x1xf32>
      tpu.vector_store %arg7[%c0_24, %c0_25], %30 {strides = array<i32>} : memref<16x1xf32, #tpu.memory_space<vmem>>, vector<16x1xf32>,
    } else {
    }
    %c0 = arith.constant 0 : index
    %c0_1 = arith.constant 0 : index
    %3 = vector.load %arg2[%c0, %c0_1] : memref<16x64xf32, #tpu.memory_space<vmem>>, vector<16x64xf32>
    %c0_2 = arith.constant 0 : index
    %c0_3 = arith.constant 0 : index
    %4 = vector.load %arg3[%c0_2, %c0_3] : memref<16x64xf32, #tpu.memory_space<vmem>>, vector<16x64xf32>
    %cst = arith.constant dense<0.000000e+00> : vector<16x16xf32>
    %5 = tpu.matmul %3, %4, %cst {dimension_numbers = #tpu.dot_dimension_numbers<[1], [1], [0], [0], [0, 0, 1, 0], [], []>} : vector<16x64xf32>, vector<16x64xf32>, vector<16x16xf32> -> vector<16x16xf32>
    %cst_4 = arith.constant 14.2857141 : f32
    %6 = vector.broadcast %cst_4 : f32 to vector<16x16xf32>
    %7 = arith.mulf %5, %6 : vector<16x16xf32>
    %8 = math.exp %7 : vector<16x16xf32>
    %c0_5 = arith.constant 0 : index
    %c0_6 = arith.constant 0 : index
    %9 = vector.load %arg5[%c0_5, %c0_6] : memref<16x1xf32, #tpu.memory_space<vmem>>, vector<16x1xf32>
    %cst_7 = arith.constant dense<0.000000e+00> : vector<16xf32>
    %10 = vector.multi_reduction <add>, %8, %cst_7 [1] : vector<16x16xf32> to vector<16xf32>
    %11 = vector.shape_cast %10 : vector<16xf32> to vector<16x1xf32>
    %12 = arith.addf %9, %11 : vector<16x1xf32>
    %c0_8 = arith.constant 0 : index
    %c0_9 = arith.constant 0 : index
    %13 = vector.load %arg5[%c0_8, %c0_9] : memref<16x1xf32, #tpu.memory_space<vmem>>, vector<16x1xf32>
    tpu.vector_store %arg5[%c0_8, %c0_9], %12 {strides = array<i32>} : memref<16x1xf32, #tpu.memory_space<vmem>>, vector<16x1xf32>,
    %c0_10 = arith.constant 0 : index
    %c0_11 = arith.constant 0 : index
    %14 = vector.load %arg6[%c0_10, %c0_11] : memref<16x1xf32, #tpu.memory_space<vmem>>, vector<16x1xf32>
    %15 = arith.mulf %8, %8 : vector<16x16xf32>
    %cst_12 = arith.constant dense<0.000000e+00> : vector<16xf32>
    %16 = vector.multi_reduction <add>, %15, %cst_12 [1] : vector<16x16xf32> to vector<16xf32>
    %17 = vector.shape_cast %16 : vector<16xf32> to vector<16x1xf32>
    %18 = arith.addf %14, %17 : vector<16x1xf32>
    %c0_13 = arith.constant 0 : index
    %c0_14 = arith.constant 0 : index
    %19 = vector.load %arg6[%c0_13, %c0_14] : memref<16x1xf32, #tpu.memory_space<vmem>>, vector<16x1xf32>
    tpu.vector_store %arg6[%c0_13, %c0_14], %18 {strides = array<i32>} : memref<16x1xf32, #tpu.memory_space<vmem>>, vector<16x1xf32>,
    %20 = arith.cmpi eq, %arg1, %arg0 : i32
    %21 = arith.extui %20 : i1 to i32
    %c0_i32_15 = arith.constant 0 : i32
    %22 = arith.cmpi ne, %21, %c0_i32_15 : i32
    scf.if %22 {
      %26 = tpu.iota {dimensions = array<i32: 0>} : vector<16x16xi32>
      %27 = tpu.iota {dimensions = array<i32: 1>} : vector<16x16xi32>
      %28 = arith.cmpi eq, %26, %27 : vector<16x16xi32>
      %cst_17 = arith.constant 0.000000e+00 : f32
      %29 = vector.broadcast %cst_17 : f32 to vector<16x16xf32>
      %30 = arith.select %28, %7, %29 : vector<16x16xi1>, vector<16x16xf32>
      %cst_18 = arith.constant dense<0.000000e+00> : vector<16xf32>
      %31 = vector.multi_reduction <add>, %30, %cst_18 [1] : vector<16x16xf32> to vector<16xf32>
      %32 = vector.shape_cast %31 : vector<16xf32> to vector<16x1xf32>
      %c0_19 = arith.constant 0 : index
      %c0_20 = arith.constant 0 : index
      %33 = vector.load %arg7[%c0_19, %c0_20] : memref<16x1xf32, #tpu.memory_space<vmem>>, vector<16x1xf32>
      tpu.vector_store %arg7[%c0_19, %c0_20], %32 {strides = array<i32>} : memref<16x1xf32, #tpu.memory_space<vmem>>, vector<16x1xf32>,
    } else {
    }
    %c1_i32 = arith.constant 1 : i32
    %23 = arith.cmpi eq, %arg1, %c1_i32 : i32
    %24 = arith.extui %23 : i1 to i32
    %c0_i32_16 = arith.constant 0 : i32
    %25 = arith.cmpi ne, %24, %c0_i32_16 : i32
    scf.if %25 {
      %c0_17 = arith.constant 0 : index
      %c0_18 = arith.constant 0 : index
      %26 = vector.load %arg7[%c0_17, %c0_18] : memref<16x1xf32, #tpu.memory_space<vmem>>, vector<16x1xf32>
      %27 = math.exp %26 : vector<16x1xf32>
      %c0_19 = arith.constant 0 : index
      %c0_20 = arith.constant 0 : index
      %28 = vector.load %arg6[%c0_19, %c0_20] : memref<16x1xf32, #tpu.memory_space<vmem>>, vector<16x1xf32>
      %29 = arith.mulf %27, %27 : vector<16x1xf32>
      %30 = arith.subf %28, %29 : vector<16x1xf32>
      %c0_21 = arith.constant 0 : index
      %c0_22 = arith.constant 0 : index
      %31 = vector.load %arg5[%c0_21, %c0_22] : memref<16x1xf32, #tpu.memory_space<vmem>>, vector<16x1xf32>
      %32 = arith.subf %31, %27 : vector<16x1xf32>
      %cst_23 = arith.constant 3.100000e+01 : f32
      %33 = vector.broadcast %cst_23 : f32 to vector<16x1xf32>
      %34 = arith.divf %32, %33 : vector<16x1xf32>
      %35 = arith.divf %30, %34 : vector<16x1xf32>
      %36 = arith.addf %35, %27 : vector<16x1xf32>
      %37 = math.log %36 : vector<16x1xf32>
      %38 = arith.subf %37, %26 : vector<16x1xf32>
      %c0_24 = arith.constant 0 : index
      %c0_25 = arith.constant 0 : index
      %39 = vector.load %arg4[%c0_24, %c0_25] : memref<16x1xf32, #tpu.memory_space<vmem>>, vector<16x1xf32>
      tpu.vector_store %arg4[%c0_24, %c0_25], %38 {strides = array<i32>} : memref<16x1xf32, #tpu.memory_space<vmem>>, vector<16x1xf32>,
    } else {
    }
    return
  }
  func.func @transform_0(%arg0: i32, %arg1: i32) -> (i32, i32) {
    %c0_i32 = arith.constant 0 : i32
    %c0_i32_0 = arith.constant 0 : i32
    return %arg0, %c0_i32 : i32, i32
  }
  func.func @transform_1(%arg0: i32, %arg1: i32) -> (i32, i32) {
    %c0_i32 = arith.constant 0 : i32
    %c0_i32_0 = arith.constant 0 : i32
    return %arg1, %c0_i32 : i32, i32
  }
  func.func @transform_2(%arg0: i32, %arg1: i32) -> (i32, i32) {
    %c0_i32 = arith.constant 0 : i32
    %c0_i32_0 = arith.constant 0 : i32
    return %arg0, %c0_i32 : i32, i32
  }
}

</mosaic_0001>

<bundles_post_ra>
// kernel: tpu_custom_call.1
= control target key start
LH: loop header
LB: loop body
LE: loop exit
PB: predicated region body
PF: predicated region fallthrough
CT: control target
= control target key end

     0   :  { %7 = vsyncpa [#allocation6], 0  ;;  %s1142_s0 = inlined_call_operand.hbm [shape: f32[32,64], index: 0, kind: input, shape index: {}]   ;;  %s1143_s1 = inlined_call_operand.hbm [shape: f32[32,64], index: 1, kind: input, shape index: {}]   ;;  %s1144_s2 = inlined_call_operand.vmem [shape: f32[32,1], index: 2, kind: output, shape index: {}]  }
   0x1   :  { %9 = vsyncpa [#allocation6 + $0x1], 0 }
   0x2   :  { %10 = vsyncpa [#allocation8], 0 }
   0x3   :  { %12 = vsyncpa [#allocation8 + $0x1], 0  ;;  %s854_s9 = smov 0   ;;  %s856_s10 = smov 0  }
   0x4   :  { %s858_s11 = smov 0   ;;  %s860_s12 = smov 0  }
   0x5   :  { %s862_s13 = smov 0   ;;  %s864_s14 = smov 0  }
   0x6   :  { %s866_s15 = smov 0   ;;  %s868_s16 = smov 0  }
   0x7   :  { %s870_s17 = smov 0   ;;  %s872_s18 = smov 0  }
   0x8   :  { %s874_s19 = smov 0  }
   0x9 LB: > { %s516_s20 = sadd.s32 4294967295, %s832_s19   ;;  %s30_s21 = sadd.s32 1, %s828_s18  ;;  %s832_s19 = sphi %s874_s19, %s18_s19   ;;  %s828_s18 = sphi %s872_s18, %s1175_s18   ;;  %s824_s17 = sphi %s870_s17, %s1174_s17   ;;  %s820_s16 = sphi %s868_s16, %s1173_s16   ;;  %s816_s15 = sphi %s866_s15, %s1172_s15   ;;  %s812_s14 = sphi %s864_s14, %s1171_s14   ;;  %s808_s13 = sphi %s862_s13, %s1170_s13   ;;  %s804_s12 = sphi %s860_s12, %s1169_s12   ;;  %s800_s11 = sphi %s858_s11, %s1168_s11   ;;  %s796_s10 = sphi %s856_s10, %s1167_s10   ;;  %s792_s9 = sphi %s854_s9, %s1166_s9  }
   0xa   : > { %p44_p0 = scmp.ne.s32.totalorder %s812_s14, %s808_s13  ;;  %p1146_p1 = scmp.eq.s32.totalorder %s832_s19, 0 }
   0xb   : > { %p50_p2 = scmp.ne.s32.totalorder %s808_s13, %s804_s12  ;;  %p913_p3 = scmp.eq.s32.totalorder %s516_s20, 0 }
   0xc   : > { %p46_p4 = por %p1146_p1, %p44_p0  ;;  %p1145_p5 = scmp.lt.s32.totalorder %s832_s19, 4 }
   0xd   : > { %p922_p6 = por %p913_p3, %p50_p2  ;;  %s126_s24 = sand.u32 1, %s812_s14  }
   0xe   : > { %s520_s25 = sshll.u32 %s126_s24, 4  ;;  %s540_s26 = sshll.u32 %s828_s18, 8 }
   0xf   : > { %s1152_s23 = scalar_select %p922_p6, 1, 0 }
  0x10   : > { %s931_s29 = scalar_lea.hbm %s1142_s0, %s540_s26  ;;  %s130_s30 = scalar_lea.vmem [#allocation5], %s520_s25 }
  0x11   : > { %s137_s3 = sshll.u32 %s130_s30, 4  ;;  %p937_p7 = pnand %p1145_p5, %p46_p4  ;;  %s933_s3 = int_to_ptr.vmem [resolvable:$true] %s137_s3 }
  0x12   : > { %s942_s5 = scalar_lea.sflag [#allocation6], %s126_s24  ;;  %s678_s6 = scalar_lea.hbm %s931_s29, 256 }
  0x13   : > { %p679_p9 = scmp.ne.s32.totalorder %s931_s29, %s678_s6  ;;  %p680_p10 = pneg %p937_p7 }
  0x14   : > { %s683_s12 = scalar_lea.hbm %s1142_s0, 512  ;;  %p684_p13 = scmp.lt.u32.totalorder %s931_s29, %s1142_s0 }
  0x15   : > { %p681_p11 = pnand %p680_p10, %p679_p9  ;;  %p685_p0 = scmp.lt.u32.totalorder %s683_s12, %s678_s6 }
  0x16   : > { %p687_p4 = scmp.lt.u32.totalorder %s678_s6, %s931_s29 }
  0x17   : > { %p682_p12 = pneg %p681_p11  ;;  %p686_p2 = por %p685_p0, %p684_p13 }
  0x19   : > { %p688_p5 = por %p687_p4, %p686_p2 }
  0x1b   : > { %p689_p1 = pnand %p688_p5, %p682_p12 }
  0x1d   : > { %692 = shalt.err (!%p689_p1)
}
  0x1e   : > { %s693_s24 = scalar_lea.vmem %s933_s3, 256  ;;  %s834_s26 = smov [#allocation5]  }
  0x1f   : > { %p694_p9 = scmp.ne.s32.totalorder %s933_s3, %s693_s24  ;;  %s698_s27 = sshll.u32 %s834_s26, 4  ;;  %s699_s27 = int_to_ptr.vmem [resolvable:$false] %s698_s27 }
  0x20   : > { %s700_s28 = scalar_lea.vmem %s699_s27, 512  ;;  %p701_p6 = scmp.lt.s32.totalorder %s933_s3, %s699_s27 }
  0x21   : > { %p696_p11 = pnand %p694_p9, %p680_p10  ;;  %p702_p13 = scmp.lt.s32.totalorder %s700_s28, %s693_s24 }
  0x23   : > { %p697_p8 = pneg %p696_p11  ;;  %p703_p0 = por %p702_p13, %p701_p6 }
  0x25   : > { %p704_p2 = pnand %p703_p0, %p697_p8 }
  0x27   : > { %707 = shalt.err (!%p704_p2)
}
  0x28   : > { %s1148_s30 = smov 128   ;;  %s1149_s6 = smov 8  }
  0x29   : > { %566 = dma.hbm_to_vmem [thread:$0]  (!%p937_p7), %s931_s29, 256, %s933_s3, %s942_s5, %s1148_s30, %s1148_s30, %s1149_s6  }
  0x2a   : > { %p166_p1 = scmp.lt.s32.totalorder %s832_s19, 5  ;;  %p1154_p5 = scmp.ge.s32.totalorder %s832_s19, 1 }
  0x2b   : > { %s37_s8 = sadd.s32 1, %s812_s14  ;;  %s27_s12 = sadd.s32 1, %s824_s17 }
  0x2c   : > { %p976_p6 = pnand %p1154_p5, %p166_p1  ;;  %p28_p8 = scmp.ge.s32.totalorder %s27_s12, 2 }
  0x2d   : > { %s63_s20 = sadd.s32 1, %s800_s11  ;;  %p70_p10 = scmp.ne.s32.totalorder %s800_s11, %s796_s10 }
  0x2e   : > { %p76_p12 = scmp.ne.s32.totalorder %s796_s10, %s792_s9  ;;  %s1177_s12 = smov (%p28_p8, %s27_s12), 0 }
  0x2f   : > { %s1179_s21 = smov (!%p28_p8, %s30_s21), %s828_s18  ;;  %s60_s29 = ssub.s32 %s824_s17, %s1177_s12 }
  0x30   : > { %s147_s3 = sand.u32 1, %s800_s11   ;;  %p32_p7 = scmp.ge.s32.totalorder %s1179_s21, 2 }
  0x31   : > { %p61_p4 = scmp.eq.s32.totalorder %s60_s29, 0  ;;  %p1156_p9 = scmp.eq.s32.totalorder %s832_s19, 0 }
  0x32   : > { %p1003_p13 = por %p76_p12, %p913_p3  ;;  %s1181_s21 = smov (%p32_p7, %s1179_s21), 0 }
  0x33   : > { %p997_p11 = por %p70_p10, %p1156_p9  ;;  %s34_s25 = ssub.s32 %s828_s18, %s1181_s21 }
  0x34   : > { %s1158_s9 = scalar_select %p1003_p13, 1, 0 }
  0x35   : > { %s1010_s5 = scalar_select %p61_p4, %s800_s11, %s63_s20  }
  0x36   : > { %s523_s24 = sshll.u32 %s147_s3, 4  ;;  %p35_p0 = scmp.eq.s32.totalorder %s34_s25, 0 }
  0x37   : > { %s541_s26 = sshll.u32 %s824_s17, 8  ;;  %s151_s27 = scalar_lea.vmem [#allocation7], %s523_s24 }
  0x38   : > { %s158_s28 = sshll.u32 %s151_s27, 4  ;;  %s1021_s6 = scalar_lea.hbm %s1143_s1, %s541_s26  ;;  %s1023_s28 = int_to_ptr.vmem [resolvable:$true] %s158_s28 }
  0x39   : > { %s1016_s29 = scalar_select %p35_p0, %s812_s14, %s37_s8  }
  0x3a   : > { %p1159_p3 = scmp.lt.s32.totalorder %s832_s19, 4  ;;  %s1033_s8 = scalar_lea.sflag [#allocation8], %s147_s3 }
  0x3b   : > { %s708_s25 = scalar_lea.hbm %s1021_s6, 256  ;;  %s713_s4 = scalar_lea.hbm %s1143_s1, 512 }
  0x3c   : > { %p1029_p2 = pnand %p1159_p3, %p997_p11  ;;  %p709_p1 = scmp.ne.s32.totalorder %s1021_s6, %s708_s25 }
  0x3d   : > { %p714_p12 = scmp.lt.u32.totalorder %s1021_s6, %s1143_s1  ;;  %p715_p7 = scmp.lt.u32.totalorder %s713_s4, %s708_s25 }
  0x3e   : > { %p710_p5 = pneg %p1029_p2  ;;  %p717_p9 = scmp.lt.u32.totalorder %s708_s25, %s1021_s6 }
  0x3f   : > { %p716_p4 = por %p715_p7, %p714_p12 }
  0x40   : > { %p711_p8 = pnand %p710_p5, %p709_p1 }
  0x41   : > { %p718_p11 = por %p717_p9, %p716_p4 }
  0x42   : > { %p712_p10 = pneg %p711_p8 }
  0x44   : > { %p719_p0 = pnand %p718_p11, %p712_p10 }
  0x46   : > { %722 = shalt.err (!%p719_p0)
}
  0x47   : > { %s723_s3 = scalar_lea.vmem %s1023_s28, 256  ;;  %s837_s22 = smov [#allocation7]  }
  0x48   : > { %p724_p3 = scmp.ne.s32.totalorder %s1023_s28, %s723_s3  ;;  %s728_s30 = sshll.u32 %s837_s22, 4  ;;  %s729_s30 = int_to_ptr.vmem [resolvable:$false] %s728_s30 }
  0x49   : > { %s730_s24 = scalar_lea.vmem %s729_s30, 512  ;;  %p731_p13 = scmp.lt.s32.totalorder %s1023_s28, %s729_s30 }
  0x4a   : > { %p726_p1 = pnand %p724_p3, %p710_p5  ;;  %p732_p12 = scmp.lt.s32.totalorder %s730_s24, %s723_s3 }
  0x4c   : > { %p727_p8 = pneg %p726_p1  ;;  %p733_p7 = por %p732_p12, %p731_p13 }
  0x4e   : > { %p734_p4 = pnand %p733_p7, %p727_p8 }
  0x50   : > { %737 = shalt.err (!%p734_p4)
}
  0x51   : > { %s1161_s25 = smov 8   ;;  %s1162_s4 = smov 128  }
  0x52   : > { %569 = dma.hbm_to_vmem [thread:$0]  (!%p1029_p2), %s1021_s6, 256, %s1023_s28, %s1033_s8, %s1162_s4, %s1162_s4, %s1161_s25  }
  0x53   : > { %170 = sbr.rel (%p976_p6) target bundleno = 555 (0x22b), region = 28  ;;  %s172_s26 = sand.u32 (!%p976_p6), 1, %s808_s13  }
  0x54   : > { %s1067_s27 = sshll.u32 (!%p976_p6), %s172_s26, 4  ;;  %s173_s3 = scalar_lea.sflag (!%p976_p6), [#allocation6], %s172_s26 }
  0x55   : > { %s176_s22 = scalar_lea.vmem (!%p976_p6), [#allocation5], %s1067_s27  ;;  %p1163_p13 = scmp.ne.s32.totalorder (!%p976_p6), %s1152_s23, 0 }
  0x5a   : > { %783 = dma.done.wait (%p1163_p13), %s173_s3, 256  }
  0x5b   : > { %785 = vsyncadd (%p1163_p13), %s173_s3, 4294967040  ;;  %s181_s20 = sand.u32 1, %s796_s10   ;;  %p1164_p6 = scmp.ne.s32.totalorder %s1158_s9, 0 }
  0x5c   : > { %s528_s6 = sshll.u32 %s181_s20, 4  ;;  %s182_s28 = scalar_lea.sflag [#allocation8], %s181_s20 }
  0x5d   : > { %s185_s7 = scalar_lea.vmem [#allocation7], %s528_s6 }
  0x5e   : > { %787 = dma.done.wait (%p1164_p6), %s182_s28, 256  }
  0x5f   : > { %789 = vsyncadd (%p1164_p6), %s182_s28, 4294967040  ;;  %s529_s8 = sshll.u32 %s820_s16, 1  ;;  %p531_p5 = scmp.ne.s32.totalorder %s816_s15, 0 }
  0x60   : > { %p214_p2 = scmp.lt.s32.totalorder %s529_s8, 3  ;;  %vm223_vm0 = vcmask (!%p531_p5), 7168   ;;  %v838_v0 = vmov (!%p531_p5), 0.0  }
  0x61   : > { %222 = sbr.rel (%p531_p5) target bundleno = 104 (0x68), region = 40  ;;  %224 = vst.msk [vmem:[#allocation2] sm:$0xff] (!%p531_p5), %vm223_vm0, %v838_v0  ;;  %225 = vst.msk [vmem:[#allocation2 + $0x8] sm:$0xff] (!%p531_p5), %vm223_vm0, %v838_v0 }
  0x62   : > { %s1183_s8 = smov (!%p214_p2, %s529_s8), 3  ;;  %226 = vst.msk [vmem:[#allocation3] sm:$0xff] (!%p531_p5), %vm223_vm0, %v838_v0  ;;  %227 = vst.msk [vmem:[#allocation3 + $0x8] sm:$0xff] (!%p531_p5), %vm223_vm0, %v838_v0 }
  0x63   : > { %s530_s30 = sshll.u32 %s1183_s8, 3  ;;  %228 = vst.msk [vmem:[#allocation4] sm:$0xff] (!%p531_p5), %vm223_vm0, %v838_v0  ;;  %229 = vst.msk [vmem:[#allocation4 + $0x8] sm:$0xff] (!%p531_p5), %vm223_vm0, %v838_v0 }
  0x64   : > { %s1083_s23 = scalar_lea.vmem %s1144_s2, %s530_s30 }
  0x68 PF: > { %v232_v1 = vld [vmem:[%s185_s7] sm:$0xff]  ;;  %v233_v2 = vld [vmem:[%s185_s7 + $0x8] sm:$0xff]  ;;  %vm234_vm1 = vcmask 523264   ;;  %vm330_vm3 = vcmask 130048   ;;  %vm339_vm4 = vcmask 7168   ;;  %p536_p10 = scmp.ne.s32.totalorder %s816_s15, %s820_s16 }
  0x69   : > { %v230_v3 = vld [vmem:[%s176_s22] sm:$0xff]  ;;  %v553_v4 = vpack.c.bf16 %v233_v2, %v232_v1  ;;  %vm554_vm2 = vmpackc.low %vm234_vm1, %vm234_vm1  ;;  %v231_v5 = vld [vmem:[%s176_s22 + $0x8] sm:$0xff]  ;;  %v360_v32 = vlaneseq (!%p536_p10) }
  0x6a   : > { %550 = vmatprep.mubr.msk.f32.mxu0 %vm234_vm1, %v230_v3  ;;  %v328_v20 = vld [vmem:[#allocation2] sm:$0xff]  ;;  %v342_v22 = vld [vmem:[#allocation3] sm:$0xff]  ;;  %v329_v25 = vld [vmem:[#allocation2 + $0x8] sm:$0xff] }
  0x6b   : > { %555 = vmatprep.subr.msk.bf16.mxu0 %vm554_vm2, %v553_v4  ;;  %v343_v28 = vld [vmem:[#allocation3 + $0x8] sm:$0xff]  ;;  %v361_v33 = vshrl.u32 (!%p536_p10), %v360_v32, 7  ;;  %v364_v34 = vand.u32 (!%p536_p10), 127, %v360_v32 }
  0x6c   : > { %558 = vmatpush3.bf16.xpose.msk.msra.mxu0 %vm554_vm2, %v553_v4 }
  0x6d   : > { %vm365_vm5 = vcmp.eq.s32.totalorder (!%p536_p10), %v361_v33, %v364_v34  ;;  %v362_v35 = vadd.s32 (!%p536_p10), 8, %v361_v33 }
  0x6f   : > { %vm366_vm6 = vcmp.eq.s32.totalorder (!%p536_p10), %v362_v35, %v364_v34 }
  0x73   : > { %551 = vmatmul.mubr.msk.f32.vlgmr.msra.gmra.mrb[0].mxu0 %vm234_vm1, %v231_v5 }
 0x146   : > { %v552_v6 = vpop.f32.mrb[0].mxu0 }
 0x147   : > { %v323_v7 = vmul.f32 14.285714, %v552_v6  ;;  %v313_v8 = vpop.f32.mrb[1].mxu0 }
 0x148   : > { %v322_v9 = vmul.f32 14.285714, %v313_v8 }
 0x149   : > { %v326_v10 = vmul.f32 1.442695, %v323_v7  ;;  %v368_v38 = vsel (!%p536_p10), %vm366_vm6, %v323_v7, 0.0 }
 0x14a   : > { %v324_v11 = vmul.f32 1.442695, %v322_v9  ;;  %v367_v36 = vsel (!%p536_p10), %vm365_vm5, %v322_v9, 0.0  ;;  %v372_v39 = vsel (!%p536_p10), %vm330_vm3, %v368_v38, 0.0 }
 0x14b   : > { %662 = vpow2.f32 %v326_v10  ;;  %v369_v37 = vsel (!%p536_p10), %vm330_vm3, %v367_v36, 0.0 }
 0x14c   : > { %664 = vpow2.f32 %v324_v11 }
 0x155   : > { %v663_v12 = vpop.eup %662 }
 0x156   : > { %v665_v13 = vpop.eup %664  ;;  %v345_v17 = vmul.f32 %v663_v12, %v663_v12  ;;  %v334_v18 = vsel %vm330_vm3, %v663_v12, 0.0 }
 0x157   : > { %v331_v14 = vsel %vm330_vm3, %v665_v13, 0.0  ;;  %v344_v15 = vmul.f32 %v665_v13, %v665_v13 }
 0x158   : > { %332 = vadd.xlane.f32.xlu0 %v331_v14  ;;  %v349_v19 = vsel %vm330_vm3, %v345_v17, 0.0 }
 0x159   : > { %v346_v16 = vsel %vm330_vm3, %v344_v15, 0.0 }
 0x15a   : > { %347 = vadd.xlane.f32.xlu1 %v346_v16 }
 0x15c   : > { %335 = vadd.xlane.f32.xlu0 %v334_v18 }
 0x15e   : > { %350 = vadd.xlane.f32.xlu1 %v349_v19 }
 0x160   : > { %370 = vadd.xlane.f32.xlu0 (!%p536_p10), %v369_v37 }
 0x164   : > { %373 = vadd.xlane.f32.xlu0 (!%p536_p10), %v372_v39 }
 0x1e5   : > { %v333_v21 = vpop.xlane.xlu0 %332 }
 0x1e6   : > { %v337_v23 = vadd.f32 %v333_v21, %v328_v20 }
 0x1e7   : > { %v348_v24 = vpop.xlane.xlu1 %347 }
 0x1e8   : > { %340 = vst.msk [vmem:[#allocation2] sm:$0xff] %vm339_vm4, %v337_v23  ;;  %v352_v26 = vadd.f32 %v348_v24, %v342_v22  ;;  %359 = sbr.rel (%p536_p10) target bundleno = 499 (0x1f3), region = 44 }
 0x1e9   : > { %v336_v27 = vpop.xlane.xlu0 %335 }
 0x1ea   : > { %354 = vst.msk [vmem:[#allocation3] sm:$0xff] %vm339_vm4, %v352_v26  ;;  %v338_v29 = vadd.f32 %v336_v27, %v329_v25 }
 0x1eb   : > { %v351_v30 = vpop.xlane.xlu1 %350 }
 0x1ec   : > { %341 = vst.msk [vmem:[#allocation2 + $0x8] sm:$0xff] %vm339_vm4, %v338_v29  ;;  %v353_v31 = vadd.f32 %v351_v30, %v343_v28 }
 0x1ed   : > { %v371_v40 = vpop.xlane.xlu0 (!%p536_p10), %370 }
 0x1ee   : > { %355 = vst.msk [vmem:[#allocation3 + $0x8] sm:$0xff] %vm339_vm4, %v353_v31  ;;  %375 = vst.msk [vmem:[#allocation4] sm:$0xff] (!%p536_p10), %vm339_vm4, %v371_v40 }
 0x1f1   : > { %v374_v41 = vpop.xlane.xlu0 %373 }
 0x1f2   : > { %376 = vst.msk [vmem:[#allocation4 + $0x8] sm:$0xff] %vm339_vm4, %v374_v41 }
 0x1f3 PF: > { %p537_p9 = scmp.ne.s32.totalorder %s816_s15, 1 }
 0x1f4   : > { %v393_v46 = vld [vmem:[#allocation2] sm:$0xff] (!%p537_p9) }
 0x1f5   : > { %380 = sbr.rel (%p537_p9) target bundleno = 555 (0x22b), region = 48  ;;  %v387_v55 = vld [vmem:[#allocation3] sm:$0xff] (!%p537_p9) }
 0x1f7   : > { %v394_v47 = vld [vmem:[#allocation2 + $0x8] sm:$0xff] (!%p537_p9) }
 0x1f9   : > { %v381_v42 = vld [vmem:[#allocation4] sm:$0xff] (!%p537_p9)  ;;  %v382_v44 = vld [vmem:[#allocation4 + $0x8] sm:$0xff] (!%p537_p9)  ;;  %v388_v57 = vld [vmem:[#allocation3 + $0x8] sm:$0xff] (!%p537_p9) }
 0x1fa   : > { %v383_v43 = vmul.f32 (!%p537_p9), 1.442695, %v381_v42  ;;  %v385_v45 = vmul.f32 (!%p537_p9), 1.442695, %v382_v44 }
 0x1fc   : > { %666 = vpow2.f32 %v383_v43 }
 0x1fd   : > { %668 = vpow2.f32 %v385_v45 }
 0x206   : > { %v667_v48 = vpop.eup %666 }
 0x207   : > { %v669_v49 = vpop.eup %668  ;;  %v395_v50 = vsub.f32 %v393_v46, %v667_v48  ;;  %v389_v54 = vmul.f32 %v667_v48, %v667_v48 }
 0x208   : > { %v396_v51 = vsub.f32 %v394_v47, %v669_v49  ;;  %v390_v56 = vmul.f32 %v669_v49, %v669_v49 }
 0x209   : > { %v398_v52 = vmul.f32 0.032258064, %v395_v50  ;;  %v391_v58 = vsub.f32 %v387_v55, %v389_v54 }
 0x20a   : > { %v399_v53 = vmul.f32 0.032258064, %v396_v51  ;;  %v392_v59 = vsub.f32 %v388_v57, %v390_v56 }
 0x20b   : > { %670 = vrcp.f32 %v398_v52 }
 0x20c   : > { %672 = vrcp.f32 %v399_v53 }
 0x215   : > { %v671_v60 = vpop.eup %670 }
 0x216   : > { %v673_v61 = vpop.eup %672  ;;  %v401_v62 = vmul.f32 %v671_v60, %v391_v58 }
 0x217   : > { %v403_v63 = vmul.f32 %v673_v61, %v392_v59 }
 0x218   : > { %v404_v0 = vadd.f32 %v667_v48, %v401_v62 }
 0x219   : > { %v405_v1 = vadd.f32 %v669_v49, %v403_v63 }
 0x21a   : > { %674 = vlog2.f32 %v404_v0 }
 0x21b   : > { %676 = vlog2.f32 %v405_v1 }
 0x224   : > { %v675_v2 = vpop.eup %674 }
 0x225   : > { %v677_v3 = vpop.eup %676  ;;  %v407_v4 = vmul.f32 0.6931472, %v675_v2 }
 0x226   : > { %v409_v5 = vmul.f32 0.6931472, %v677_v3 }
 0x227   : > { %v410_v6 = vsub.f32 %v407_v4, %v381_v42 }
 0x228   : > { %v411_v7 = vsub.f32 %v409_v5, %v382_v44 }
 0x229   : > { %412 = vst.msk [vmem:[%s1083_s23] sm:$0xff] %vm339_vm4, %v410_v6 }
 0x22a   : > { %413 = vst.msk [vmem:[%s1083_s23 + $0x8] sm:$0xff] %vm339_vm4, %v411_v7 }
 0x22b PF: > { %s18_s19 = sadd.s32 1, %s832_s19   ;;  %s1165_s4 = smov %s1177_s12 }
 0x22c   : > { %p15_p11 = scmp.ge.s32.totalorder %s18_s19, 6   ;;  %s1166_s9 = smov %s796_s10 }
 0x22d   : > { %s1167_s10 = smov %s800_s11  ;;  %s1168_s11 = smov %s1010_s5 }
 0x22e   : > { %s1169_s12 = smov %s808_s13  ;;  %s1170_s13 = smov %s812_s14 }
 0x22f   : > { %s1171_s14 = smov %s1016_s29  ;;  %s1172_s15 = smov %s824_s17 }
 0x230   : > { %s1173_s16 = smov %s828_s18  ;;  %s1174_s17 = smov %s1165_s4 }
 0x231   : > { %s1175_s18 = smov %s1181_s21  ;;  %17 = sbr.rel (!%p15_p11) target bundleno = 9 (0x9), region = 93 }
 0x238   :  { %436 = vsyncpa [#allocation6], 1 }
 0x239   :  { %438 = vsyncpa [#allocation6 + $0x1], 1 }
 0x23a   :  { %439 = vsyncpa [#allocation8], 1 }
 0x23b   :  { %441 = vsyncpa [#allocation8 + $0x1], 1 }

</bundles_post_ra>
